<compile_context>
chip_gen: v7x
topology: tpu7x:2x2x1
jax: 0.10.0
libtpu: 0.0.40
codegen_flags: <defaults>
</compile_context>

<pallas_src>
import functools

import jax
import jax.numpy as jnp
from jax.experimental import pallas as pl
from jax.experimental.pallas import tpu as pltpu

FEAT_TOKEN_TYPE = 3      # stand-in for TokenType.FEAT
LN_EPS = 1e-12           # BERT-style config.layer_norm_eps


def _round_up(a, b):
    return (a + b - 1) // b * b


def _tpu_budget(h_dim):
    """Per-generation tile cap / VMEM limit. v5e/v6e: 128 MiB VMEM, v7x: 64 MiB."""
    vmem_bytes = 64 * 1024 * 1024  # conservative fallback (v7x-sized)
    try:
        vmem_bytes = int(pltpu.get_tpu_info().vmem_capacity_bytes)
    except Exception:
        pass
    if vmem_bytes >= 100 * 1024 * 1024:          # v5e / v6e (128 MiB physical)
        tile_cap = 2048 if h_dim <= 256 else 512  # amortize per-step overhead at small H
        vmem_limit = 96 * 1024 * 1024
    else:                                         # v7x (64 MiB physical)
        tile_cap = 512
        vmem_limit = 48 * 1024 * 1024
    return tile_cap, vmem_limit


def _head_kernel(x_ref, w1_ref, pvec_ref, side_ref, preds_ref, err_ref, *, inv_h):
    # ---- dense (H,H): bf16 MXU with f32 accumulation; bf16 cast done in-kernel ----
    xb = x_ref[...].astype(jnp.bfloat16)                    # (TILE_M, H)
    h = jnp.dot(xb, w1_ref[...], preferred_element_type=jnp.float32)

    pv = pvec_ref[...]            # (8, H) resident f32: [b1, w2*gamma, ones, W, c, 0, 0, 0]
    b1 = pv[0:1, :]
    w_sum = pv[3:4, 0:1]          # (1,1) scalar: sum(w2*gamma)
    c_aff = pv[4:5, 0:1]          # (1,1) scalar: sum(w2*beta) + b2

    h = h + b1
    # tanh-approximate GELU: goes to the EUP instead of a long erf VALU polynomial.
    h = jax.nn.gelu(h, approximate=True)

    # LayerNorm folded into the decoder; stats and the decoder dot product all come
    # out lane-dense from two (8,H) x (TILE_M,H)^T bf16 MXU matmuls.
    lhs = pv.astype(jnp.bfloat16)                           # rows 1/2 = [w2*gamma, ones]
    hb = h.astype(jnp.bfloat16)
    h2b = (h * h).astype(jnp.bfloat16)
    dn = (((1,), (1,)), ((), ()))
    stats_h = jax.lax.dot_general(lhs, hb, dn, preferred_element_type=jnp.float32)
    stats_h2 = jax.lax.dot_general(lhs, h2b, dn, preferred_element_type=jnp.float32)
    d = stats_h[1:2, :]                                     # (1, TILE_M): h . (w2*gamma)
    s1 = stats_h[2:3, :]                                    # (1, TILE_M): sum(h)
    s2 = stats_h2[2:3, :]                                   # (1, TILE_M): sum(h^2)

    mu = s1 * inv_h
    var = jnp.maximum(s2 * inv_h - mu * mu, 0.0)            # clamp: avoid rsqrt(<0)
    inv_std = jax.lax.rsqrt(var + LN_EPS)
    logits = inv_std * (d - mu * w_sum) + c_aff             # (1, TILE_M)

    # ---- ExpDive ----
    preds = jnp.exp(logits) - jnp.exp(-logits)

    # ---- masking; loss is reduced outside from the lane-dense per-token errors ----
    side = side_ref[0]                                      # (3, TILE_M) f32
    molf = side[0:1, :]
    mm = side[1:2, :]
    tt = side[2:3, :]
    feat_mask = tt == FEAT_TOKEN_TYPE
    final_mask = feat_mask & (mm != 0)

    preds_ref[0] = jnp.where(feat_mask, preds, 0.0)
    err_ref[0] = jnp.where(final_mask, jnp.square(preds - molf), 0.0)


def mol_feature_modelling_head(features, mol_features, mm_mask, token_type_ids, params):
    B, T, H = features.shape
    N = B * T

    tile_cap, vmem_limit = _tpu_budget(H)
    # >= 2 grid tiles whenever possible so ("parallel",) can shard across both
    # TensorCores on v7x; tiles are multiples of 8 sublanes.
    tile_m = max(8, min(tile_cap, _round_up(pl.cdiv(N, 2), 8)))
    n_pad = _round_up(N, tile_m)
    num_tiles = n_pad // tile_m

    # Activations streamed as f32 (bf16 cast happens in-kernel); pad only a ragged tail.
    x = features.reshape(N, H).astype(jnp.float32)
    if n_pad != N:
        x = jnp.pad(x, ((0, n_pad - N), (0, 0)))
    w1 = params["w1"].astype(jnp.bfloat16)                  # (H, H) resident weight

    # Packed resident per-column params (f32, one DMA):
    #   row0=b1, row1=w2*gamma, row2=ones, row3=sum(w2*gamma), row4=sum(w2*beta)+b2
    w2 = params["w2"].astype(jnp.float32)
    gamma = params["ln_gamma"].astype(jnp.float32)
    beta = params["ln_beta"].astype(jnp.float32)
    b2 = params["b2"].astype(jnp.float32).reshape(())
    w2g = w2 * gamma
    w_sum = jnp.sum(w2g)
    c_aff = jnp.sum(w2 * beta) + b2
    ones_h = jnp.ones((H,), jnp.float32)
    zeros_h = jnp.zeros((H,), jnp.float32)
    pvec = jnp.stack([
        params["b1"].astype(jnp.float32),
        w2g,
        ones_h,
        w_sum * ones_h,
        c_aff * ones_h,
        zeros_h, zeros_h, zeros_h,
    ], axis=0)

    # Lane-dense packed side inputs (num_tiles, 3, tile_m): [mol_features, mm_mask, tt].
    # Padded rows get mm=0 (excluded from loss) and tt=-1 (never FEAT).
    def _pad1(v, fill):
        v = v.reshape(N).astype(jnp.float32)
        if n_pad != N:
            v = jnp.pad(v, (0, n_pad - N), constant_values=fill)
        return v
    side = jnp.stack([
        _pad1(mol_features, 0.0),
        _pad1(mm_mask, 0.0),
        _pad1(token_type_ids, -1.0),
    ], axis=0).reshape(3, num_tiles, tile_m).transpose(1, 0, 2)

    kernel = functools.partial(_head_kernel, inv_h=1.0 / H)

    flops = 2 * n_pad * H * H + 2 * (2 * 8 * n_pad * H) + 8 * n_pad * H
    transcendentals = n_pad * H + 3 * n_pad
    bytes_accessed = (n_pad * H * 4 + H * H * 2 + 8 * H * 4
                      + 3 * n_pad * 4 + 2 * n_pad * 4)

    def _call(single_buffer_residents):
        res_kwargs = (dict(pipeline_mode=pl.Buffered(1))
                      if single_buffer_residents else {})
        return pl.pallas_call(
            kernel,
            grid=(num_tiles,),
            in_specs=[
                pl.BlockSpec((tile_m, H), lambda i: (i, 0)),            # x: streamed f32
                pl.BlockSpec((H, H), lambda i: (0, 0), **res_kwargs),   # w1: resident
                pl.BlockSpec((8, H), lambda i: (0, 0), **res_kwargs),   # packed params
                pl.BlockSpec((1, 3, tile_m), lambda i: (i, 0, 0)),      # side (lane-dense)
            ],
            out_specs=[
                pl.BlockSpec((1, 1, tile_m), lambda i: (i, 0, 0)),      # preds (lane-dense)
                pl.BlockSpec((1, 1, tile_m), lambda i: (i, 0, 0)),      # sq. errors
            ],
            out_shape=[
                jax.ShapeDtypeStruct((num_tiles, 1, tile_m), jnp.float32),
                jax.ShapeDtypeStruct((num_tiles, 1, tile_m), jnp.float32),
            ],
            compiler_params=pltpu.CompilerParams(
                dimension_semantics=("parallel",),        # independent tiles -> 2 TCs on v7x
                vmem_limit_bytes=vmem_limit,
            ),
            cost_estimate=pl.CostEstimate(
                flops=flops, transcendentals=transcendentals,
                bytes_accessed=bytes_accessed),
        )(x, w1, pvec, side)

    try:
        preds_tiles, err_tiles = _call(single_buffer_residents=True)
    except Exception:
        # Fallback for JAX versions that reject pl.Buffered(1) on resident inputs.
        preds_tiles, err_tiles = _call(single_buffer_residents=False)

    # loss = mse.mean(dim=0).sum() == sum(masked sq. errors) / B, reduced in f32.
    loss = jnp.sum(err_tiles) * (1.0 / B)
    preds = preds_tiles.reshape(n_pad)[:N].reshape(B, T)
    return loss, preds


def _reference(features, mol_features, mm_mask, token_type_ids, params):
    """Pure-JAX f32 reference mirroring the PyTorch forward (erf GELU, full LayerNorm)."""
    H = features.shape[-1]
    h = features @ params["w1"] + params["b1"]
    h = jax.nn.gelu(h, approximate=False)
    mu = h.mean(-1, keepdims=True)
    var = ((h - mu) ** 2).mean(-1, keepdims=True)
    hn = (h - mu) / jnp.sqrt(var + LN_EPS) * params["ln_gamma"] + params["ln_beta"]
    logits = hn @ params["w2"].reshape(H, 1) + params["b2"]            # (B, T, 1)
    preds = (jnp.exp(logits) - jnp.exp(-logits)).squeeze(-1)           # (B, T)
    feat_mask = token_type_ids == FEAT_TOKEN_TYPE
    final_mask = feat_mask & mm_mask
    mse = jnp.where(final_mask, (preds - mol_features) ** 2, 0.0)
    loss = mse.mean(axis=0).sum()
    return loss, jnp.where(feat_mask, preds, 0.0)


if __name__ == "__main__":
    B, T, H = 2, 8, 32
    key = jax.random.PRNGKey(0)
    k = jax.random.split(key, 8)

    params = {
        "w1": jax.random.normal(k[0], (H, H), jnp.float32) * 0.05,
        "b1": jax.random.normal(k[1], (H,), jnp.float32) * 0.01,
        "ln_gamma": jnp.ones((H,), jnp.float32),
        "ln_beta": jnp.zeros((H,), jnp.float32),
        "w2": jax.random.normal(k[2], (H,), jnp.float32) * 0.05,
        "b2": jnp.zeros((1,), jnp.float32),
    }

    features = jax.random.normal(k[3], (B, T, H), jnp.float32)
    mol_features = jax.random.normal(k[4], (B, T), jnp.float32)
    mm_mask = jax.random.bernoulli(k[5], 0.5, (B, T))
    token_type_ids = jax.random.randint(k[6], (B, T), 0, 6, jnp.int32)

    loss, preds_masked = mol_feature_modelling_head(
        features, mol_features, mm_mask, token_type_ids, params)
    jax.block_until_ready((loss, preds_masked))

    ref_loss, ref_preds = _reference(features, mol_features, mm_mask, token_type_ids, params)
    # Tolerance covers bf16 MXU matmuls (f32 accumulation), the folded-LayerNorm
    # decoder and tanh-approximate GELU vs. the pure-f32 erf reference.
    assert jnp.allclose(loss, ref_loss, atol=3e-2, rtol=3e-2), (loss, ref_loss)
    assert jnp.allclose(preds_masked, ref_preds, atol=3e-2, rtol=3e-2)

    print("KERNEL_OK")
</pallas_src>

<mosaic_0001>
module attributes {stable_mosaic.version = 11 : i64} {
  func.func @_head_kernel(%arg0: i32, %arg1: memref<8x32xf32, #tpu.memory_space<vmem>>, %arg2: memref<32x32xbf16, #tpu.memory_space<vmem>>, %arg3: memref<8x32xf32, #tpu.memory_space<vmem>>, %arg4: memref<1x3x8xf32, #tpu.memory_space<vmem>>, %arg5: memref<1x1x8xf32, #tpu.memory_space<vmem>>, %arg6: memref<1x1x8xf32, #tpu.memory_space<vmem>>) attributes {dimension_semantics = [#tpu.dimension_semantics<parallel>], iteration_bounds = array<i64: 2>, scalar_prefetch = 0 : i64, scratch_operands = 0 : i64, tpu.core_type = #tpu.core_type<tc>, window_params = [{transform_indices = @transform_0, window_bounds = array<i64: 8, 32>}, {pipeline_mode = #tpu.pipeline_mode<synchronous>, transform_indices = @transform_1, window_bounds = array<i64: 32, 32>}, {pipeline_mode = #tpu.pipeline_mode<synchronous>, transform_indices = @transform_2, window_bounds = array<i64: 8, 32>}, {transform_indices = @transform_3, window_bounds = array<i64: 1, 3, 8>}, {transform_indices = @transform_4, window_bounds = array<i64: 1, 1, 8>}, {transform_indices = @transform_5, window_bounds = array<i64: 1, 1, 8>}]} {
    %c0 = arith.constant 0 : index
    %c0_0 = arith.constant 0 : index
    %0 = vector.load %arg1[%c0, %c0_0] : memref<8x32xf32, #tpu.memory_space<vmem>>, vector<8x32xf32>
    %1 = arith.truncf %0 : vector<8x32xf32> to vector<8x32xbf16>
    %c0_1 = arith.constant 0 : index
    %c0_2 = arith.constant 0 : index
    %2 = vector.load %arg2[%c0_1, %c0_2] : memref<32x32xbf16, #tpu.memory_space<vmem>>, vector<32x32xbf16>
    %cst = arith.constant dense<0.000000e+00> : vector<8x32xf32>
    %3 = tpu.matmul %1, %2, %cst {dimension_numbers = #tpu.dot_dimension_numbers<[1], [0], [0], [1], [0, 0, 1, 1], [], []>} : vector<8x32xbf16>, vector<32x32xbf16>, vector<8x32xf32> -> vector<8x32xf32>
    %c0_3 = arith.constant 0 : index
    %c0_4 = arith.constant 0 : index
    %4 = vector.load %arg3[%c0_3, %c0_4] : memref<8x32xf32, #tpu.memory_space<vmem>>, vector<8x32xf32>
    %5 = vector.extract_strided_slice %4 {offsets = [0, 0], sizes = [1, 32], strides = [1, 1]} : vector<8x32xf32> to vector<1x32xf32>
    %6 = vector.extract_strided_slice %4 {offsets = [3, 0], sizes = [1, 1], strides = [1, 1]} : vector<8x32xf32> to vector<1x1xf32>
    %7 = vector.extract_strided_slice %4 {offsets = [4, 0], sizes = [1, 1], strides = [1, 1]} : vector<8x32xf32> to vector<1x1xf32>
    %8 = vector.broadcast %5 : vector<1x32xf32> to vector<8x32xf32>
    %9 = arith.addf %3, %8 : vector<8x32xf32>
    %10 = arith.mulf %9, %9 : vector<8x32xf32>
    %11 = arith.mulf %9, %10 : vector<8x32xf32>
    %cst_5 = arith.constant 4.471500e-02 : f32
    %12 = vector.broadcast %cst_5 : f32 to vector<8x32xf32>
    %13 = arith.mulf %12, %11 : vector<8x32xf32>
    %14 = arith.addf %9, %13 : vector<8x32xf32>
    %cst_6 = arith.constant 0.797884583 : f32
    %15 = vector.broadcast %cst_6 : f32 to vector<8x32xf32>
    %16 = arith.mulf %15, %14 : vector<8x32xf32>
    %17 = math.tanh %16 : vector<8x32xf32>
    %cst_7 = arith.constant 1.000000e+00 : f32
    %18 = vector.broadcast %cst_7 : f32 to vector<8x32xf32>
    %19 = arith.addf %18, %17 : vector<8x32xf32>
    %cst_8 = arith.constant 5.000000e-01 : f32
    %20 = vector.broadcast %cst_8 : f32 to vector<8x32xf32>
    %21 = arith.mulf %20, %19 : vector<8x32xf32>
    %22 = arith.mulf %9, %21 : vector<8x32xf32>
    %23 = arith.truncf %4 : vector<8x32xf32> to vector<8x32xbf16>
    %24 = arith.truncf %22 : vector<8x32xf32> to vector<8x32xbf16>
    %25 = arith.mulf %22, %22 : vector<8x32xf32>
    %26 = arith.truncf %25 : vector<8x32xf32> to vector<8x32xbf16>
    %cst_9 = arith.constant dense<0.000000e+00> : vector<8x8xf32>
    %27 = tpu.matmul %23, %24, %cst_9 {dimension_numbers = #tpu.dot_dimension_numbers<[1], [1], [0], [0], [0, 0, 1, 0], [], []>} : vector<8x32xbf16>, vector<8x32xbf16>, vector<8x8xf32> -> vector<8x8xf32>
    %cst_10 = arith.constant dense<0.000000e+00> : vector<8x8xf32>
    %28 = tpu.matmul %23, %26, %cst_10 {dimension_numbers = #tpu.dot_dimension_numbers<[1], [1], [0], [0], [0, 0, 1, 0], [], []>} : vector<8x32xbf16>, vector<8x32xbf16>, vector<8x8xf32> -> vector<8x8xf32>
    %29 = vector.extract_strided_slice %27 {offsets = [1, 0], sizes = [1, 8], strides = [1, 1]} : vector<8x8xf32> to vector<1x8xf32>
    %30 = vector.extract_strided_slice %27 {offsets = [2, 0], sizes = [1, 8], strides = [1, 1]} : vector<8x8xf32> to vector<1x8xf32>
    %31 = vector.extract_strided_slice %28 {offsets = [2, 0], sizes = [1, 8], strides = [1, 1]} : vector<8x8xf32> to vector<1x8xf32>
    %cst_11 = arith.constant 3.125000e-02 : f32
    %32 = vector.broadcast %cst_11 : f32 to vector<1x8xf32>
    %33 = arith.mulf %30, %32 : vector<1x8xf32>
    %cst_12 = arith.constant 3.125000e-02 : f32
    %34 = vector.broadcast %cst_12 : f32 to vector<1x8xf32>
    %35 = arith.mulf %31, %34 : vector<1x8xf32>
    %36 = arith.mulf %33, %33 : vector<1x8xf32>
    %37 = arith.subf %35, %36 : vector<1x8xf32>
    %cst_13 = arith.constant 0.000000e+00 : f32
    %38 = vector.broadcast %cst_13 : f32 to vector<1x8xf32>
    %39 = arith.maximumf %37, %38 : vector<1x8xf32>
    %cst_14 = arith.constant 9.99999996E-13 : f32
    %40 = vector.broadcast %cst_14 : f32 to vector<1x8xf32>
    %41 = arith.addf %39, %40 : vector<1x8xf32>
    %42 = math.rsqrt %41 : vector<1x8xf32>
    %43 = vector.broadcast %6 : vector<1x1xf32> to vector<1x8xf32>
    %44 = arith.mulf %33, %43 : vector<1x8xf32>
    %45 = arith.subf %29, %44 : vector<1x8xf32>
    %46 = arith.mulf %42, %45 : vector<1x8xf32>
    %47 = vector.broadcast %7 : vector<1x1xf32> to vector<1x8xf32>
    %48 = arith.addf %46, %47 : vector<1x8xf32>
    %49 = math.exp %48 : vector<1x8xf32>
    %cst_15 = arith.constant 0.000000e+00 : f32
    %50 = vector.broadcast %cst_15 : f32 to vector<1x8xf32>
    %51 = arith.subf %50, %48 : vector<1x8xf32>
    %52 = math.exp %51 : vector<1x8xf32>
    %53 = arith.subf %49, %52 : vector<1x8xf32>
    %c0_16 = arith.constant 0 : index
    %c0_17 = arith.constant 0 : index
    %c0_18 = arith.constant 0 : index
    %54 = vector.load %arg4[%c0_16, %c0_17, %c0_18] : memref<1x3x8xf32, #tpu.memory_space<vmem>>, vector<1x3x8xf32>
    %55 = vector.shape_cast %54 : vector<1x3x8xf32> to vector<3x8xf32>
    %56 = vector.extract_strided_slice %55 {offsets = [0, 0], sizes = [1, 8], strides = [1, 1]} : vector<3x8xf32> to vector<1x8xf32>
    %57 = vector.extract_strided_slice %55 {offsets = [1, 0], sizes = [1, 8], strides = [1, 1]} : vector<3x8xf32> to vector<1x8xf32>
    %58 = vector.extract_strided_slice %55 {offsets = [2, 0], sizes = [1, 8], strides = [1, 1]} : vector<3x8xf32> to vector<1x8xf32>
    %cst_19 = arith.constant 3.000000e+00 : f32
    %59 = vector.broadcast %cst_19 : f32 to vector<1x8xf32>
    %60 = arith.cmpf oeq, %58, %59 : vector<1x8xf32>
    %cst_20 = arith.constant 0.000000e+00 : f32
    %61 = vector.broadcast %cst_20 : f32 to vector<1x8xf32>
    %62 = arith.cmpf one, %57, %61 : vector<1x8xf32>
    %63 = arith.andi %60, %62 : vector<1x8xi1>
    %cst_21 = arith.constant 0.000000e+00 : f32
    %64 = vector.broadcast %cst_21 : f32 to vector<1x8xf32>
    %65 = arith.select %60, %53, %64 : vector<1x8xi1>, vector<1x8xf32>
    %c0_22 = arith.constant 0 : index
    %c0_23 = arith.constant 0 : index
    %c0_24 = arith.constant 0 : index
    %66 = vector.load %arg5[%c0_22, %c0_23, %c0_24] : memref<1x1x8xf32, #tpu.memory_space<vmem>>, vector<1x1x8xf32>
    %67 = vector.shape_cast %66 : vector<1x1x8xf32> to vector<1x8xf32>
    %68 = vector.shape_cast %65 : vector<1x8xf32> to vector<1x1x8xf32>
    tpu.vector_store %arg5[%c0_22, %c0_23, %c0_24], %68 {strides = array<i32>} : memref<1x1x8xf32, #tpu.memory_space<vmem>>, vector<1x1x8xf32>,
    %69 = arith.subf %53, %56 : vector<1x8xf32>
    %70 = arith.mulf %69, %69 : vector<1x8xf32>
    %cst_25 = arith.constant 0.000000e+00 : f32
    %71 = vector.broadcast %cst_25 : f32 to vector<1x8xf32>
    %72 = arith.select %63, %70, %71 : vector<1x8xi1>, vector<1x8xf32>
    %c0_26 = arith.constant 0 : index
    %c0_27 = arith.constant 0 : index
    %c0_28 = arith.constant 0 : index
    %73 = vector.load %arg6[%c0_26, %c0_27, %c0_28] : memref<1x1x8xf32, #tpu.memory_space<vmem>>, vector<1x1x8xf32>
    %74 = vector.shape_cast %73 : vector<1x1x8xf32> to vector<1x8xf32>
    %75 = vector.shape_cast %72 : vector<1x8xf32> to vector<1x1x8xf32>
    tpu.vector_store %arg6[%c0_26, %c0_27, %c0_28], %75 {strides = array<i32>} : memref<1x1x8xf32, #tpu.memory_space<vmem>>, vector<1x1x8xf32>,
    return
  }
  func.func @transform_0(%arg0: i32) -> (i32, i32) {
    %c0_i32 = arith.constant 0 : i32
    %c0_i32_0 = arith.constant 0 : i32
    return %arg0, %c0_i32 : i32, i32
  }
  func.func @transform_1(%arg0: i32) -> (i32, i32) {
    %c0_i32 = arith.constant 0 : i32
    %c0_i32_0 = arith.constant 0 : i32
    %c0_i32_1 = arith.constant 0 : i32
    return %c0_i32, %c0_i32_0 : i32, i32
  }
  func.func @transform_2(%arg0: i32) -> (i32, i32) {
    %c0_i32 = arith.constant 0 : i32
    %c0_i32_0 = arith.constant 0 : i32
    %c0_i32_1 = arith.constant 0 : i32
    return %c0_i32, %c0_i32_0 : i32, i32
  }
  func.func @transform_3(%arg0: i32) -> (i32, i32, i32) {
    %c0_i32 = arith.constant 0 : i32
    %c0_i32_0 = arith.constant 0 : i32
    %c0_i32_1 = arith.constant 0 : i32
    return %arg0, %c0_i32, %c0_i32_0 : i32, i32, i32
  }
  func.func @transform_4(%arg0: i32) -> (i32, i32, i32) {
    %c0_i32 = arith.constant 0 : i32
    %c0_i32_0 = arith.constant 0 : i32
    %c0_i32_1 = arith.constant 0 : i32
    return %arg0, %c0_i32, %c0_i32_0 : i32, i32, i32
  }
  func.func @transform_5(%arg0: i32) -> (i32, i32, i32) {
    %c0_i32 = arith.constant 0 : i32
    %c0_i32_0 = arith.constant 0 : i32
    %c0_i32_1 = arith.constant 0 : i32
    return %arg0, %c0_i32, %c0_i32_0 : i32, i32, i32
  }
}

module attributes {stable_mosaic.version = 11 : i64} {
  func.func @_head_kernel(%arg0: i32, %arg1: memref<8x32xf32, #tpu.memory_space<vmem>>, %arg2: memref<32x32xbf16, #tpu.memory_space<vmem>>, %arg3: memref<8x32xf32, #tpu.memory_space<vmem>>, %arg4: memref<1x3x8xf32, #tpu.memory_space<vmem>>, %arg5: memref<1x1x8xf32, #tpu.memory_space<vmem>>, %arg6: memref<1x1x8xf32, #tpu.memory_space<vmem>>) attributes {dimension_semantics = [#tpu.dimension_semantics<parallel>], iteration_bounds = array<i64: 2>, scalar_prefetch = 0 : i64, scratch_operands = 0 : i64, tpu.core_type = #tpu.core_type<tc>, window_params = [{transform_indices = @transform_0, window_bounds = array<i64: 8, 32>}, {pipeline_mode = #tpu.pipeline_mode<synchronous>, transform_indices = @transform_1, window_bounds = array<i64: 32, 32>}, {pipeline_mode = #tpu.pipeline_mode<synchronous>, transform_indices = @transform_2, window_bounds = array<i64: 8, 32>}, {transform_indices = @transform_3, window_bounds = array<i64: 1, 3, 8>}, {transform_indices = @transform_4, window_bounds = array<i64: 1, 1, 8>}, {transform_indices = @transform_5, window_bounds = array<i64: 1, 1, 8>}]} {
    %c0 = arith.constant 0 : index
    %c0_0 = arith.constant 0 : index
    %0 = vector.load %arg1[%c0, %c0_0] : memref<8x32xf32, #tpu.memory_space<vmem>>, vector<8x32xf32>
    %1 = arith.truncf %0 : vector<8x32xf32> to vector<8x32xbf16>
    %c0_1 = arith.constant 0 : index
    %c0_2 = arith.constant 0 : index
    %2 = vector.load %arg2[%c0_1, %c0_2] : memref<32x32xbf16, #tpu.memory_space<vmem>>, vector<32x32xbf16>
    %cst = arith.constant dense<0.000000e+00> : vector<8x32xf32>
    %3 = tpu.matmul %1, %2, %cst {dimension_numbers = #tpu.dot_dimension_numbers<[1], [0], [0], [1], [0, 0, 1, 1], [], []>} : vector<8x32xbf16>, vector<32x32xbf16>, vector<8x32xf32> -> vector<8x32xf32>
    %c0_3 = arith.constant 0 : index
    %c0_4 = arith.constant 0 : index
    %4 = vector.load %arg3[%c0_3, %c0_4] : memref<8x32xf32, #tpu.memory_space<vmem>>, vector<8x32xf32>
    %5 = vector.extract_strided_slice %4 {offsets = [0, 0], sizes = [1, 32], strides = [1, 1]} : vector<8x32xf32> to vector<1x32xf32>
    %6 = vector.extract_strided_slice %4 {offsets = [3, 0], sizes = [1, 1], strides = [1, 1]} : vector<8x32xf32> to vector<1x1xf32>
    %7 = vector.extract_strided_slice %4 {offsets = [4, 0], sizes = [1, 1], strides = [1, 1]} : vector<8x32xf32> to vector<1x1xf32>
    %8 = vector.broadcast %5 : vector<1x32xf32> to vector<8x32xf32>
    %9 = arith.addf %3, %8 : vector<8x32xf32>
    %10 = arith.mulf %9, %9 : vector<8x32xf32>
    %11 = arith.mulf %9, %10 : vector<8x32xf32>
    %cst_5 = arith.constant 4.471500e-02 : f32
    %12 = vector.broadcast %cst_5 : f32 to vector<8x32xf32>
    %13 = arith.mulf %12, %11 : vector<8x32xf32>
    %14 = arith.addf %9, %13 : vector<8x32xf32>
    %cst_6 = arith.constant 0.797884583 : f32
    %15 = vector.broadcast %cst_6 : f32 to vector<8x32xf32>
    %16 = arith.mulf %15, %14 : vector<8x32xf32>
    %17 = math.tanh %16 : vector<8x32xf32>
    %cst_7 = arith.constant 1.000000e+00 : f32
    %18 = vector.broadcast %cst_7 : f32 to vector<8x32xf32>
    %19 = arith.addf %18, %17 : vector<8x32xf32>
    %cst_8 = arith.constant 5.000000e-01 : f32
    %20 = vector.broadcast %cst_8 : f32 to vector<8x32xf32>
    %21 = arith.mulf %20, %19 : vector<8x32xf32>
    %22 = arith.mulf %9, %21 : vector<8x32xf32>
    %23 = arith.truncf %4 : vector<8x32xf32> to vector<8x32xbf16>
    %24 = arith.truncf %22 : vector<8x32xf32> to vector<8x32xbf16>
    %25 = arith.mulf %22, %22 : vector<8x32xf32>
    %26 = arith.truncf %25 : vector<8x32xf32> to vector<8x32xbf16>
    %cst_9 = arith.constant dense<0.000000e+00> : vector<8x8xf32>
    %27 = tpu.matmul %23, %24, %cst_9 {dimension_numbers = #tpu.dot_dimension_numbers<[1], [1], [0], [0], [0, 0, 1, 0], [], []>} : vector<8x32xbf16>, vector<8x32xbf16>, vector<8x8xf32> -> vector<8x8xf32>
    %cst_10 = arith.constant dense<0.000000e+00> : vector<8x8xf32>
    %28 = tpu.matmul %23, %26, %cst_10 {dimension_numbers = #tpu.dot_dimension_numbers<[1], [1], [0], [0], [0, 0, 1, 0], [], []>} : vector<8x32xbf16>, vector<8x32xbf16>, vector<8x8xf32> -> vector<8x8xf32>
    %29 = vector.extract_strided_slice %27 {offsets = [1, 0], sizes = [1, 8], strides = [1, 1]} : vector<8x8xf32> to vector<1x8xf32>
    %30 = vector.extract_strided_slice %27 {offsets = [2, 0], sizes = [1, 8], strides = [1, 1]} : vector<8x8xf32> to vector<1x8xf32>
    %31 = vector.extract_strided_slice %28 {offsets = [2, 0], sizes = [1, 8], strides = [1, 1]} : vector<8x8xf32> to vector<1x8xf32>
    %cst_11 = arith.constant 3.125000e-02 : f32
    %32 = vector.broadcast %cst_11 : f32 to vector<1x8xf32>
    %33 = arith.mulf %30, %32 : vector<1x8xf32>
    %cst_12 = arith.constant 3.125000e-02 : f32
    %34 = vector.broadcast %cst_12 : f32 to vector<1x8xf32>
    %35 = arith.mulf %31, %34 : vector<1x8xf32>
    %36 = arith.mulf %33, %33 : vector<1x8xf32>
    %37 = arith.subf %35, %36 : vector<1x8xf32>
    %cst_13 = arith.constant 0.000000e+00 : f32
    %38 = vector.broadcast %cst_13 : f32 to vector<1x8xf32>
    %39 = arith.maximumf %37, %38 : vector<1x8xf32>
    %cst_14 = arith.constant 9.99999996E-13 : f32
    %40 = vector.broadcast %cst_14 : f32 to vector<1x8xf32>
    %41 = arith.addf %39, %40 : vector<1x8xf32>
    %42 = math.rsqrt %41 : vector<1x8xf32>
    %43 = vector.broadcast %6 : vector<1x1xf32> to vector<1x8xf32>
    %44 = arith.mulf %33, %43 : vector<1x8xf32>
    %45 = arith.subf %29, %44 : vector<1x8xf32>
    %46 = arith.mulf %42, %45 : vector<1x8xf32>
    %47 = vector.broadcast %7 : vector<1x1xf32> to vector<1x8xf32>
    %48 = arith.addf %46, %47 : vector<1x8xf32>
    %49 = math.exp %48 : vector<1x8xf32>
    %cst_15 = arith.constant 0.000000e+00 : f32
    %50 = vector.broadcast %cst_15 : f32 to vector<1x8xf32>
    %51 = arith.subf %50, %48 : vector<1x8xf32>
    %52 = math.exp %51 : vector<1x8xf32>
    %53 = arith.subf %49, %52 : vector<1x8xf32>
    %c0_16 = arith.constant 0 : index
    %c0_17 = arith.constant 0 : index
    %c0_18 = arith.constant 0 : index
    %54 = vector.load %arg4[%c0_16, %c0_17, %c0_18] : memref<1x3x8xf32, #tpu.memory_space<vmem>>, vector<1x3x8xf32>
    %55 = vector.shape_cast %54 : vector<1x3x8xf32> to vector<3x8xf32>
    %56 = vector.extract_strided_slice %55 {offsets = [0, 0], sizes = [1, 8], strides = [1, 1]} : vector<3x8xf32> to vector<1x8xf32>
    %57 = vector.extract_strided_slice %55 {offsets = [1, 0], sizes = [1, 8], strides = [1, 1]} : vector<3x8xf32> to vector<1x8xf32>
    %58 = vector.extract_strided_slice %55 {offsets = [2, 0], sizes = [1, 8], strides = [1, 1]} : vector<3x8xf32> to vector<1x8xf32>
    %cst_19 = arith.constant 3.000000e+00 : f32
    %59 = vector.broadcast %cst_19 : f32 to vector<1x8xf32>
    %60 = arith.cmpf oeq, %58, %59 : vector<1x8xf32>
    %cst_20 = arith.constant 0.000000e+00 : f32
    %61 = vector.broadcast %cst_20 : f32 to vector<1x8xf32>
    %62 = arith.cmpf one, %57, %61 : vector<1x8xf32>
    %63 = arith.andi %60, %62 : vector<1x8xi1>
    %cst_21 = arith.constant 0.000000e+00 : f32
    %64 = vector.broadcast %cst_21 : f32 to vector<1x8xf32>
    %65 = arith.select %60, %53, %64 : vector<1x8xi1>, vector<1x8xf32>
    %c0_22 = arith.constant 0 : index
    %c0_23 = arith.constant 0 : index
    %c0_24 = arith.constant 0 : index
    %66 = vector.load %arg5[%c0_22, %c0_23, %c0_24] : memref<1x1x8xf32, #tpu.memory_space<vmem>>, vector<1x1x8xf32>
    %67 = vector.shape_cast %66 : vector<1x1x8xf32> to vector<1x8xf32>
    %68 = vector.shape_cast %65 : vector<1x8xf32> to vector<1x1x8xf32>
    tpu.vector_store %arg5[%c0_22, %c0_23, %c0_24], %68 {strides = array<i32>} : memref<1x1x8xf32, #tpu.memory_space<vmem>>, vector<1x1x8xf32>,
    %69 = arith.subf %53, %56 : vector<1x8xf32>
    %70 = arith.mulf %69, %69 : vector<1x8xf32>
    %cst_25 = arith.constant 0.000000e+00 : f32
    %71 = vector.broadcast %cst_25 : f32 to vector<1x8xf32>
    %72 = arith.select %63, %70, %71 : vector<1x8xi1>, vector<1x8xf32>
    %c0_26 = arith.constant 0 : index
    %c0_27 = arith.constant 0 : index
    %c0_28 = arith.constant 0 : index
    %73 = vector.load %arg6[%c0_26, %c0_27, %c0_28] : memref<1x1x8xf32, #tpu.memory_space<vmem>>, vector<1x1x8xf32>
    %74 = vector.shape_cast %73 : vector<1x1x8xf32> to vector<1x8xf32>
    %75 = vector.shape_cast %72 : vector<1x8xf32> to vector<1x1x8xf32>
    tpu.vector_store %arg6[%c0_26, %c0_27, %c0_28], %75 {strides = array<i32>} : memref<1x1x8xf32, #tpu.memory_space<vmem>>, vector<1x1x8xf32>,
    return
  }
  func.func @transform_0(%arg0: i32) -> (i32, i32) {
    %c0_i32 = arith.constant 0 : i32
    %c0_i32_0 = arith.constant 0 : i32
    return %arg0, %c0_i32 : i32, i32
  }
  func.func @transform_1(%arg0: i32) -> (i32, i32) {
    %c0_i32 = arith.constant 0 : i32
    %c0_i32_0 = arith.constant 0 : i32
    %c0_i32_1 = arith.constant 0 : i32
    return %c0_i32, %c0_i32_0 : i32, i32
  }
  func.func @transform_2(%arg0: i32) -> (i32, i32) {
    %c0_i32 = arith.constant 0 : i32
    %c0_i32_0 = arith.constant 0 : i32
    %c0_i32_1 = arith.constant 0 : i32
    return %c0_i32, %c0_i32_0 : i32, i32
  }
  func.func @transform_3(%arg0: i32) -> (i32, i32, i32) {
    %c0_i32 = arith.constant 0 : i32
    %c0_i32_0 = arith.constant 0 : i32
    %c0_i32_1 = arith.constant 0 : i32
    return %arg0, %c0_i32, %c0_i32_0 : i32, i32, i32
  }
  func.func @transform_4(%arg0: i32) -> (i32, i32, i32) {
    %c0_i32 = arith.constant 0 : i32
    %c0_i32_0 = arith.constant 0 : i32
    %c0_i32_1 = arith.constant 0 : i32
    return %arg0, %c0_i32, %c0_i32_0 : i32, i32, i32
  }
  func.func @transform_5(%arg0: i32) -> (i32, i32, i32) {
    %c0_i32 = arith.constant 0 : i32
    %c0_i32_0 = arith.constant 0 : i32
    %c0_i32_1 = arith.constant 0 : i32
    return %arg0, %c0_i32, %c0_i32_0 : i32, i32, i32
  }
}

</mosaic_0001>

<bundles_post_ra>
// kernel: tpu_custom_call.1
= control target key start
LH: loop header
LB: loop body
LE: loop exit
PB: predicated region body
PF: predicated region fallthrough
CT: control target
= control target key end

     0   :  { %11 = vsyncpa [#allocation3], 0  ;;  %s1233_s0 = inlined_call_operand.hbm [shape: f32[16,32], index: 0, kind: input, shape index: {}]   ;;  %s1234_s1 = inlined_call_operand.vmem [shape: bf16[32,32], index: 1, kind: input, shape index: {}]   ;;  %s1235_s2 = inlined_call_operand.hbm [shape: f32[8,32], index: 2, kind: input, shape index: {}]   ;;  %s1236_s3 = inlined_call_operand.vmem [shape: f32[2,3,8], index: 3, kind: input, shape index: {}]   ;;  %s1237_s4 = inlined_call_operand.hbm [shape: f32[2,1,8], index: 4, kind: output, shape index: {0}]   ;;  %s1238_s5 = inlined_call_operand.hbm [shape: f32[2,1,8], index: 5, kind: output, shape index: {1}]  }
   0x1   :  { %13 = vsyncpa [#allocation3 + $0x1], 0 }
   0x2   :  { %14 = vsyncpa [#allocation6], 0 }
   0x3   :  { %15 = vsyncpa [#allocation4], 0 }
   0x4   :  { %17 = vsyncpa [#allocation4 + $0x1], 0 }
   0x5   :  { %18 = vsyncpa [#allocation9], 0 }
   0x6   :  { %20 = vsyncpa [#allocation9 + $0x1], 0  ;;  %s964_s18 = smov 0   ;;  %s966_s19 = smov 0  }
   0x7   :  { %s968_s20 = smov 0   ;;  %s970_s21 = smov 0  }
   0x8 LB: > { %s985_s22 = sadd.s32 4294967295, %s925_s21   ;;  %s643_s23 = sadd.s32 4294967294, %s925_s21   ;;  %s925_s21 = sphi %s970_s21, %s1264_s21   ;;  %s921_s20 = sphi %s968_s20, %s1263_s20   ;;  %s917_s19 = sphi %s966_s19, %s1262_s19   ;;  %s913_s18 = sphi %s964_s18, %s1261_s18  }
   0x9   : > { %p46_p0 = scmp.ne.s32.totalorder %s917_s19, %s913_s18  ;;  %p1239_p1 = scmp.eq.s32.totalorder %s985_s22, 0 }
   0xa   : > { %p144_p3 = scmp.eq.s32.totalorder %s643_s23, 1  ;;  %p644_p5 = scmp.ge.s32.totalorder %s925_s21, 1 }
   0xb   : > { %p994_p4 = por %p1239_p1, %p46_p0  ;;  %p177_p7 = scmp.lt.s32.totalorder %s925_s21, 3 }
   0xc   : > { %p999_p6 = por %p144_p3, %p46_p0  ;;  %s927_s27 = smov [#allocation5]  }
   0xd   : > { %s1242_s24 = scalar_select %p994_p4, 1, 0 }
   0xe   : > { %s1243_s25 = scalar_select %p999_p6, 1, 0 }
   0xf   : > { %p1004_p8 = pnand %p644_p5, %p177_p7  ;;  %s193_s28 = sshll.u32 %s927_s27, 4  ;;  %s194_s28 = int_to_ptr.vmem [resolvable:$true] %s193_s28 }
  0x10   : > { %s1012_s29 = sadd.s32 1, %s925_s21   ;;  %s33_s8 = sadd.s32 1, %s921_s20 }
  0x11   : > { %s1244_s26 = scalar_select %p1004_p8, 1, 0 }
  0x12   : > { %p699_p10 = pneg %p1004_p8  ;;  %s30_s6 = ssub.s32 %s925_s21, %s1012_s29 }
  0x13   : > { %p1022_p12 = scmp.eq.s32.totalorder %s30_s6, 0  ;;  %s765_s11 = scalar_lea.hbm %s1235_s2, 128 }
  0x14   : > { %p1016_p11 = pnand %p699_p10, %p1239_p1  ;;  %p766_p0 = scmp.ne.s32.totalorder %s1235_s2, %s765_s11 }
  0x15   : > { %s1246_s7 = scalar_select %p1022_p12, 1, 0 }
  0x16   : > { %p767_p3 = pneg %p1016_p11  ;;  %p772_p10 = scmp.lt.u32.totalorder %s765_s11, %s1235_s2 }
  0x18   : > { %p768_p5 = pnand %p767_p3, %p766_p0 }
  0x1a   : > { %p769_p7 = pneg %p768_p5 }
  0x1c   : > { %p774_p9 = pnand %p772_p10, %p769_p7 }
  0x1e   : > { %777 = shalt.err (!%p774_p9)
}
  0x1f   : > { %s778_s16 = scalar_lea.vmem %s194_s28, 128  ;;  %p786_p6 = scmp.lt.s32.totalorder %s194_s28, %s194_s28 }
  0x20   : > { %p779_p1 = scmp.ne.s32.totalorder %s194_s28, %s778_s16  ;;  %p787_p4 = scmp.lt.s32.totalorder %s778_s16, %s778_s16 }
  0x22   : > { %p781_p2 = pnand %p779_p1, %p767_p3  ;;  %p788_p8 = por %p787_p4, %p786_p6 }
  0x24   : > { %p782_p13 = pneg %p781_p2 }
  0x26   : > { %p789_p12 = pnand %p788_p8, %p782_p13 }
  0x28   : > { %792 = shalt.err (!%p789_p12)
}
  0x29   : > { %702 = dma.hbm_to_vmem [thread:$0]  (!%p1016_p11), %s1235_s2, 128, %s194_s28, [#allocation6]  }
  0x2a   : > { %p1247_p1 = scmp.ne.s32.totalorder %s1246_s7, 0  ;;  %p41_p2 = scmp.eq.s32.totalorder %s925_s21, 0 }
  0x2b   : > { %p1248_p4 = scmp.ne.s32.totalorder %s921_s20, %s917_s19  ;;  %p1249_p6 = scmp.eq.s32.totalorder %s985_s22, 1 }
  0x2c   : > { %s1048_s27 = scalar_select %p1247_p1, %s921_s20, %s33_s8  }
  0x2d   : > { %p1056_p8 = por %p1249_p6, %p1248_p4  ;;  %p715_p9 = scmp.lt.s32.totalorder %s925_s21, 2 }
  0x2e   : > { %s204_s6 = sand.u32 1, %s921_s20   ;;  %p1251_p12 = pmov %p1248_p4 }
  0x2f   : > { %s647_s9 = sshll.u32 %s204_s6, 3  ;;  %s648_s10 = sshll.u32 %s925_s21, 7 }
  0x30   : > { %p42_p13 = por %p41_p2, %p1251_p12  ;;  %s1069_s28 = scalar_lea.hbm %s1233_s0, %s648_s10 }
  0x31   : > { %s208_s7 = scalar_lea.vmem [#allocation2], %s647_s9  ;;  %s205_s14 = scalar_lea.sflag [#allocation3], %s204_s6 }
  0x32   : > { %s215_s8 = sshll.u32 %s208_s7, 4  ;;  %p1071_p11 = pnand %p715_p9, %p42_p13  ;;  %s1075_s8 = int_to_ptr.vmem [resolvable:$true] %s215_s8 }
  0x33   : > { %s793_s15 = scalar_lea.hbm %s1069_s28, 128  ;;  %s798_s23 = scalar_lea.hbm %s1233_s0, 256 }
  0x34   : > { %p794_p0 = scmp.ne.s32.totalorder %s1069_s28, %s793_s15  ;;  %p795_p3 = pneg %p1071_p11 }
  0x35   : > { %p799_p10 = scmp.lt.u32.totalorder %s1069_s28, %s1233_s0  ;;  %p800_p1 = scmp.lt.u32.totalorder %s798_s23, %s793_s15 }
  0x36   : > { %p796_p5 = pnand %p795_p3, %p794_p0  ;;  %p802_p4 = scmp.lt.u32.totalorder %s793_s15, %s1069_s28 }
  0x37   : > { %p801_p2 = por %p800_p1, %p799_p10 }
  0x38   : > { %p797_p7 = pneg %p796_p5 }
  0x39   : > { %p803_p6 = por %p802_p4, %p801_p2 }
  0x3b   : > { %p804_p9 = pnand %p803_p6, %p797_p7 }
  0x3d   : > { %807 = shalt.err (!%p804_p9)
}
  0x3e   : > { %s808_s6 = scalar_lea.vmem %s1075_s8, 128  ;;  %s928_s11 = smov [#allocation2]  }
  0x3f   : > { %p809_p12 = scmp.ne.s32.totalorder %s1075_s8, %s808_s6  ;;  %s813_s12 = sshll.u32 %s928_s11, 4  ;;  %s814_s12 = int_to_ptr.vmem [resolvable:$false] %s813_s12 }
  0x40   : > { %s815_s7 = scalar_lea.vmem %s814_s12, 256  ;;  %p816_p5 = scmp.lt.s32.totalorder %s1075_s8, %s814_s12 }
  0x41   : > { %p811_p13 = pnand %p809_p12, %p795_p3  ;;  %p817_p10 = scmp.lt.s32.totalorder %s815_s7, %s808_s6 }
  0x43   : > { %p812_p0 = pneg %p811_p13  ;;  %p818_p1 = por %p817_p10, %p816_p5 }
  0x45   : > { %p819_p2 = pnand %p818_p1, %p812_p0 }
  0x47   : > { %822 = shalt.err (!%p819_p2)
}
  0x48   : > { %706 = dma.hbm_to_vmem [thread:$0]  (!%p1071_p11), %s1069_s28, 128, %s1075_s8, %s205_s14  }
  0x49   : > { %p1253_p7 = scmp.ne.s32.totalorder %s1244_s26, 0 }
  0x4a   : > { %s1105_s15 = sand.u32 (!%p1253_p7), 1, %s917_s19   ;;  %p1254_p3 = scmp.ne.s32.totalorder (!%p1253_p7), %s1242_s24, 0 }
  0x4b   : > { %231 = sbr.rel (%p1253_p7) target bundleno = 639 (0x27f), region = 36  ;;  %s650_s16 = sshll.u32 (!%p1253_p7), %s1105_s15, 3 }
  0x4c   : > { %s234_s17 = scalar_lea.sflag (!%p1253_p7), [#allocation3], %s1105_s15  ;;  %s237_s23 = scalar_lea.vmem (!%p1253_p7), [#allocation2], %s650_s16 }
  0x52   : > { %896 = dma.done.wait (%p1254_p3), %s234_s17, 128  }
  0x53   : > { %898 = vsyncadd (%p1254_p3), %s234_s17, 4294967168  ;;  %p1255_p4 = scmp.eq.s32.totalorder %s985_s22, 0 }
  0x55   : > { %900 = dma.done.wait (%p1255_p4), [#allocation6], 128   ;;  %p1256_p11 = pmov %p1255_p4 }
  0x56   : > { %v929_v0 = vmov 0.0   ;;  %vm930_vm0 = vmmov 0   ;;  %v755_v1 = vld [vmem:[%s1234_s1] sm:$0xff]   ;;  %v756_v2 = vld [vmem:[%s1234_s1 + $0x8] sm:$0xff]   ;;  %vm303_vm1 = vcmask 261120   ;;  %v286_v5 = vld [vmem:[#allocation5] sm:$0xff]  ;;  %v287_v7 = vlaneseq }
  0x57   : > { %902 = vsyncadd (%p1256_p11), [#allocation6], 4294967168  ;;  %669 = vmatprep.subr.bf16.mxu0 %v929_v0  ;;  %673 = vmatprep.mubr.msk.bf16.mxu0 %vm930_vm0, %v929_v0  ;;  %v280_v3 = vld [vmem:[%s237_s23] sm:$0xff]  ;;  %v931_v6 = vmov 0   ;;  %v356_v30 = vpack.c.bf16 %v286_v5, %v286_v5  ;;  %p275_p6 = scmp.lt.s32.totalorder %s985_s22, 1  ;;  %s658_s11 = sshll.u32 %s985_s22, 4 }
  0x58   : > { %677 = vmatprep.subr.bf16.mxu1 %v929_v0  ;;  %679 = vmatprep.mubr.msk.bf16.mxu1 %vm930_vm0, %v929_v0  ;;  %v281_v4 = vpack.c.bf16 %v280_v3, %v280_v3  ;;  %v288_v8 = vshrl.u32 %v287_v7, 7  ;;  %s268_s12 = scalar_lea.vmem [#allocation7], %s1105_s15  ;;  %vm488_vm5 = vcmask 59394   ;;  %s1142_s23 = scalar_lea.hbm %s1237_s4, %s658_s11 }
  0x59   : > { %670 = vmatpush3.bf16.msra.mxu0 %v755_v1  ;;  %754 = vset.pattern.permute.xlu0 %v931_v6  ;;  %s276_s13 = scalar_select %p275_p6, %s985_s22, 1 }
  0x5a   : > { %671 = vmatprep.subr.bf16.mxu0 %v929_v0  ;;  %458 = vperm.xlu0 %754, %v286_v5   ;;  %v289_v9 = vsub.s32 0, %v288_v8  ;;  %s514_s7 = sshll.u32 %s268_s12, 4  ;;  %s274_s26 = scalar_lea.vmem [#allocation8], %s1105_s15  ;;  %s1144_s7 = int_to_ptr.vmem [resolvable:$true] %s514_s7 }
  0x5b   : > { %s652_s14 = sshll.u32 %s276_s13, 2  ;;  %s1149_s28 = sshll.u32 %s274_s26, 4  ;;  %s1186_s28 = int_to_ptr.vmem [resolvable:$true] %s1149_s28 }
  0x5c   : > { %v290_v10 = vrot.slane %v286_v5, %v289_v9  ;;  %s278_s6 = scalar_lea.vmem %s1236_s3, %s652_s14  ;;  %s498_s8 = scalar_lea.sflag [#allocation4], %s1105_s15 }
  0x5d   : > { %672 = vmatpush3.bf16.msra.mxu0 %v756_v2  ;;  %v480_v57 = vld [vmem:[%s278_s6] sm:$0x7]  ;;  %s823_s24 = scalar_lea.vmem %s1144_s7, 16  ;;  %s932_s13 = smov [#allocation7]  }
  0x5e   : > { %683 = vmatprep.subr.bf16.mxu0 %v929_v0  ;;  %vm482_vm2 = vcmp.ne.f32.partialorder %v480_v57, 0.0  ;;  %v491_v62 = vrot.slane %v480_v57, 6  ;;  %vm481_vm3 = vcmp.eq.f32.partialorder %v480_v57, 3.0  ;;  %p824_p9 = scmp.ne.s32.totalorder %s1144_s7, %s823_s24  ;;  %s827_s14 = sshll.u32 %s932_s13, 4  ;;  %s828_s14 = int_to_ptr.vmem [resolvable:$false] %s827_s14 }
  0x5f   : > { %v483_v59 = vsel %vm482_vm2, 1, %v931_v6  ;;  %s829_s9 = scalar_lea.vmem %s828_s14, 32  ;;  %p830_p0 = scmp.lt.s32.totalorder %s1144_s7, %s828_s14 }
  0x60   : > { %674 = vmatmul.mubr.msk.bf16.vlgmr.msra.gmra.mrb[0].mxu0 %vm303_vm1, %v281_v4  ;;  %v484_v60 = vrot.slane %v483_v59, 7  ;;  %p825_p12 = pnand %p824_p9, %p1056_p8  ;;  %p831_p5 = scmp.lt.s32.totalorder %s829_s9, %s823_s24 }
  0x61   : > { %685 = vmatprep.mubr.msk.bf16.mxu0 %vm930_vm0, %v929_v0 }
  0x62   : > { %vm485_vm4 = vcmp.ne.s32.totalorder %v484_v60, 0  ;;  %p826_p13 = pneg %p825_p12  ;;  %p832_p10 = por %p831_p5, %p830_p0 }
  0x63   : > { %vm1151_vm6 = vmand %vm481_vm3, %vm485_vm4 }
  0x64   : > { %p833_p1 = pnand %p832_p10, %p826_p13 }
  0xd9   : > { %v459_v32 = vpop.permute.xlu0 %458 }
  0xda   : > { %v460_v41 = vrot.slane %v459_v32, 1  ;;  %v471_v52 = vrot.slane %v459_v32, 2 }
 0x133   : > { %v341_v11 = vpop.f32.mrb[0].mxu0 }
 0x134   : > { %v342_v12 = vadd.f32 %v341_v11, %v290_v10  ;;  %v675_v13 = vpop.f32.mrb[1].mxu0 }
 0x135   : > { %v344_v14 = vpop.f32.mrb[2].mxu0 }
 0x136   : > { %v347_v15 = vmul.f32 %v342_v12, %v342_v12  ;;  %v676_v16 = vpop.f32.mrb[3].mxu0 }
 0x138   : > { %v348_v17 = vmul.f32 %v347_v15, %v342_v12 }
 0x13a   : > { %v349_v18 = vmul.f32 0.044715, %v348_v17 }
 0x13c   : > { %v350_v19 = vadd.f32 %v349_v18, %v342_v12 }
 0x13e   : > { %v351_v20 = vmul.f32 0.7978846, %v350_v19 }
 0x140   : > { %757 = vtanh.f32 %v351_v20 }
 0x14a   : > { %v758_v21 = vpop.eup %757 }
 0x14b   : > { %v353_v22 = vadd.f32 1.0, %v758_v21 }
 0x14d   : > { %v354_v23 = vmul.f32 0.5, %v353_v22 }
 0x14f   : > { %v355_v24 = vmul.f32 %v354_v23, %v342_v12 }
 0x151   : > { %v357_v25 = vpack.c.bf16 %v355_v24, %v355_v24  ;;  %v358_v26 = vmul.f32 %v355_v24, %v355_v24 }
 0x153   : > { %v364_v27 = vsel %vm303_vm1, %v357_v25, 0  ;;  %v359_v28 = vpack.c.bf16 %v358_v26, %v358_v26 }
 0x154   : > { %678 = vmatpush3.bf16.xpose.msra.mxu1 %v364_v27 }
 0x155   : > { %v407_v29 = vsel %vm303_vm1, %v359_v28, 0 }
 0x156   : > { %684 = vmatpush3.bf16.xpose.msra.mxu0 %v407_v29 }
 0x15b   : > { %680 = vmatmul.mubr.msk.bf16.vlgmr.msra.gmra.mrb[0].mxu1 %vm303_vm1, %v356_v30 }
 0x15d   : > { %686 = vmatmul.mubr.msk.bf16.vlgmr.msra.gmra.mrb[4].mxu0 %vm303_vm1, %v356_v30 }
 0x22e   : > { %v400_v31 = vpop.f32.mrb[0].mxu1 }
 0x22f   : > { %v449_v33 = vmul.f32 0.03125, %v400_v31  ;;  %v681_v34 = vpop.f32.mrb[1].mxu1 }
 0x230   : > { %v403_v35 = vpop.f32.mrb[2].mxu1  ;;  %v443_v36 = vpop.f32.mrb[4].mxu0 }
 0x231   : > { %v451_v37 = vmul.f32 %v449_v33, %v449_v33  ;;  %v450_v38 = vmul.f32 0.03125, %v443_v36  ;;  %v682_v39 = vpop.f32.mrb[3].mxu1  ;;  %v687_v40 = vpop.f32.mrb[5].mxu0  ;;  %v462_v46 = vmul.f32 %v460_v41, %v449_v33 }
 0x232   : > { %v446_v42 = vpop.f32.mrb[6].mxu0 }
 0x233   : > { %v452_v43 = vsub.f32 %v450_v38, %v451_v37  ;;  %v688_v44 = vpop.f32.mrb[7].mxu0  ;;  %v464_v48 = vrot.slane %v462_v46, 1 }
 0x235   : > { %v453_v45 = vmax.f32 %v452_v43, 0.0  ;;  %v466_v49 = vsub.f32 %v400_v31, %v464_v48 }
 0x237   : > { %v454_v47 = vadd.f32 1e-12, %v453_v45  ;;  %v468_v50 = vrot.slane %v466_v49, 7 }
 0x239   : > { %759 = vrsqrt.f32 %v454_v47 }
 0x243   : > { %v760_v51 = vpop.eup %759 }
 0x244   : > { %v470_v53 = vmul.f32 %v760_v51, %v468_v50 }
 0x246   : > { %v473_v54 = vadd.f32 %v471_v52, %v470_v53 }
 0x248   : > { %v474_v55 = vmul.f32 1.442695, %v473_v54  ;;  %v476_v56 = vsub.f32 0.0, %v473_v54 }
 0x24a   : > { %v477_v58 = vmul.f32 1.442695, %v476_v56  ;;  %761 = vpow2.f32 %v474_v55 }
 0x24c   : > { %763 = vpow2.f32 %v477_v58 }
 0x254   : > { %v762_v61 = vpop.eup %761 }
 0x256   : > { %v764_v63 = vpop.eup %763 }
 0x257   : > { %v479_v0 = vsub.f32 %v762_v61, %v764_v63 }
 0x259   : > { %v487_v1 = vsel %vm481_vm3, %v479_v0, 0.0  ;;  %v493_v2 = vsub.f32 %v479_v0, %v491_v62 }
 0x25a   : > { %489 = vst.msk [vmem:[%s268_s12 - $0x2] sm:$0x4] %vm488_vm5, %v487_v1 }
 0x25b   : > { %836 = shalt.err (!%p833_p1)
}
 0x25c   : > { %s837_s10 = scalar_lea.hbm %s1142_s23, 16  ;;  %s841_s16 = scalar_lea.hbm %s1237_s4, 32 }
 0x25d   : > { %p838_p2 = scmp.ne.s32.totalorder %s1142_s23, %s837_s10  ;;  %p842_p4 = scmp.lt.u32.totalorder %s1142_s23, %s1237_s4 }
 0x25e   : > { %p843_p11 = scmp.lt.u32.totalorder %s841_s16, %s837_s10  ;;  %p845_p9 = scmp.lt.u32.totalorder %s837_s10, %s1142_s23 }
 0x25f   : > { %p839_p7 = pnand %p838_p2, %p1056_p8 }
 0x260   : > { %p844_p6 = por %p843_p11, %p842_p4 }
 0x261   : > { %p840_p3 = pneg %p839_p7 }
 0x262   : > { %p846_p12 = por %p845_p9, %p844_p6 }
 0x264   : > { %p847_p13 = pnand %p846_p12, %p840_p3 }
 0x266   : > { %850 = shalt.err (!%p847_p13)
}
 0x267   : > { %695 = dma.vmem_to_hbm [thread:$0]  (%p1056_p8), %s1144_s7, 16, %s1142_s23, %s498_s8   ;;  %v494_v4 = vmul.f32 %v493_v2, %v493_v2 }
 0x268   : > { %s1183_s9 = scalar_lea.hbm %s1238_s5, %s658_s11  ;;  %s502_s10 = scalar_lea.sflag [#allocation9], %s1105_s15 }
 0x269   : > { %v495_v5 = vsel %vm1151_vm6, %v494_v4, 0.0  ;;  %s851_s7 = scalar_lea.vmem %s1186_s28, 16  ;;  %s933_s22 = smov [#allocation8]  }
 0x26a   : > { %496 = vst.msk [vmem:[%s274_s26 - $0x2] sm:$0x4] %vm488_vm5, %v495_v5  ;;  %p852_p0 = scmp.ne.s32.totalorder %s1186_s28, %s851_s7  ;;  %s855_s11 = sshll.u32 %s933_s22, 4  ;;  %s856_s11 = int_to_ptr.vmem [resolvable:$false] %s855_s11 }
 0x26b   : > { %s857_s23 = scalar_lea.vmem %s856_s11, 32  ;;  %p858_p1 = scmp.lt.s32.totalorder %s1186_s28, %s856_s11 }
 0x26c   : > { %p853_p5 = pnand %p852_p0, %p1056_p8  ;;  %p859_p2 = scmp.lt.s32.totalorder %s857_s23, %s851_s7 }
 0x26e   : > { %p854_p10 = pneg %p853_p5  ;;  %p860_p7 = por %p859_p2, %p858_p1 }
 0x270   : > { %p861_p3 = pnand %p860_p7, %p854_p10 }
 0x272   : > { %864 = shalt.err (!%p861_p3)
}
 0x273   : > { %s865_s15 = scalar_lea.hbm %s1183_s9, 16  ;;  %s869_s6 = scalar_lea.hbm %s1238_s5, 32 }
 0x274   : > { %p866_p4 = scmp.ne.s32.totalorder %s1183_s9, %s865_s15  ;;  %p870_p9 = scmp.lt.u32.totalorder %s1183_s9, %s1238_s5 }
 0x275   : > { %p871_p12 = scmp.lt.u32.totalorder %s869_s6, %s865_s15  ;;  %p873_p0 = scmp.lt.u32.totalorder %s865_s15, %s1183_s9 }
 0x276   : > { %p867_p11 = pnand %p866_p4, %p1056_p8 }
 0x277   : > { %p872_p13 = por %p871_p12, %p870_p9 }
 0x278   : > { %p868_p6 = pneg %p867_p11 }
 0x279   : > { %p874_p5 = por %p873_p0, %p872_p13 }
 0x27b   : > { %p875_p10 = pnand %p874_p5, %p868_p6 }
 0x27d   : > { %878 = shalt.err (!%p875_p10)
}
 0x27e   : > { %696 = dma.vmem_to_hbm [thread:$0]  (%p1056_p8), %s1186_s28, 16, %s1183_s9, %s502_s10  }
 0x27f PF: > { %s539_s17 = sand.u32 1, %s913_s18   ;;  %p1259_p1 = scmp.ne.s32.totalorder %s1243_s25, 0 }
 0x280   : > { %p1260_p2 = scmp.ge.s32.totalorder %s925_s21, 2  ;;  %s540_s13 = scalar_lea.sflag [#allocation4], %s539_s17 }
 0x282   : > { %p708_p7 = pnand %p1260_p2, %p1259_p1 }
 0x284   : > { %904 = dma.done.wait (!%p708_p7), %s540_s13, 16  }
 0x285   : > { %906 = vsyncadd (!%p708_p7), %s540_s13, 4294967280  ;;  %s548_s24 = scalar_lea.sflag [#allocation9], %s539_s17 }
 0x286   : > { %908 = dma.done.wait (!%p708_p7), %s548_s24, 16  }
 0x287   : > { %910 = vsyncadd (!%p708_p7), %s548_s24, 4294967280  ;;  %p23_p8 = scmp.ge.s32.totalorder %s1012_s29, 4   ;;  %s1261_s18 = smov %s917_s19 }
 0x288   : > { %s1262_s19 = smov %s921_s20  ;;  %s1263_s20 = smov %s1048_s27 }
 0x289   : > { %s1264_s21 = smov %s1012_s29  ;;  %25 = sbr.rel (!%p23_p8) target bundleno = 8 (0x8), region = 105 }
 0x290   :  { %552 = vsyncpa [#allocation3], 1 }
 0x291   :  { %554 = vsyncpa [#allocation3 + $0x1], 1 }
 0x292   :  { %555 = vsyncpa [#allocation6], 1 }
 0x293   :  { %556 = vsyncpa [#allocation4], 1 }
 0x294   :  { %558 = vsyncpa [#allocation4 + $0x1], 1 }
 0x295   :  { %559 = vsyncpa [#allocation9], 1 }
 0x296   :  { %561 = vsyncpa [#allocation9 + $0x1], 1 }

// kernel: tpu_custom_call.1
= control target key start
LH: loop header
LB: loop body
LE: loop exit
PB: predicated region body
PF: predicated region fallthrough
CT: control target
= control target key end

     0   :  { %11 = vsyncpa [#allocation3], 0  ;;  %s1233_s0 = inlined_call_operand.hbm [shape: f32[16,32], index: 0, kind: input, shape index: {}]   ;;  %s1234_s1 = inlined_call_operand.vmem [shape: bf16[32,32], index: 1, kind: input, shape index: {}]   ;;  %s1235_s2 = inlined_call_operand.hbm [shape: f32[8,32], index: 2, kind: input, shape index: {}]   ;;  %s1236_s3 = inlined_call_operand.vmem [shape: f32[2,3,8], index: 3, kind: input, shape index: {}]   ;;  %s1237_s4 = inlined_call_operand.hbm [shape: f32[2,1,8], index: 4, kind: output, shape index: {0}]   ;;  %s1238_s5 = inlined_call_operand.hbm [shape: f32[2,1,8], index: 5, kind: output, shape index: {1}]  }
   0x1   :  { %13 = vsyncpa [#allocation3 + $0x1], 0 }
   0x2   :  { %14 = vsyncpa [#allocation6], 0 }
   0x3   :  { %15 = vsyncpa [#allocation4], 0 }
   0x4   :  { %17 = vsyncpa [#allocation4 + $0x1], 0 }
   0x5   :  { %18 = vsyncpa [#allocation9], 0 }
   0x6   :  { %20 = vsyncpa [#allocation9 + $0x1], 0  ;;  %s964_s18 = smov 0   ;;  %s966_s19 = smov 0  }
   0x7   :  { %s968_s20 = smov 0   ;;  %s970_s21 = smov 0  }
   0x8 LB: > { %s985_s22 = sadd.s32 4294967295, %s925_s21   ;;  %s643_s23 = sadd.s32 4294967294, %s925_s21   ;;  %s925_s21 = sphi %s970_s21, %s1264_s21   ;;  %s921_s20 = sphi %s968_s20, %s1263_s20   ;;  %s917_s19 = sphi %s966_s19, %s1262_s19   ;;  %s913_s18 = sphi %s964_s18, %s1261_s18  }
   0x9   : > { %p46_p0 = scmp.ne.s32.totalorder %s917_s19, %s913_s18  ;;  %p1239_p1 = scmp.eq.s32.totalorder %s985_s22, 0 }
   0xa   : > { %p144_p3 = scmp.eq.s32.totalorder %s643_s23, 1  ;;  %p644_p5 = scmp.ge.s32.totalorder %s925_s21, 1 }
   0xb   : > { %p994_p4 = por %p1239_p1, %p46_p0  ;;  %p177_p7 = scmp.lt.s32.totalorder %s925_s21, 3 }
   0xc   : > { %p999_p6 = por %p144_p3, %p46_p0  ;;  %s927_s27 = smov [#allocation5]  }
   0xd   : > { %s1242_s24 = scalar_select %p994_p4, 1, 0 }
   0xe   : > { %s1243_s25 = scalar_select %p999_p6, 1, 0 }
   0xf   : > { %p1004_p8 = pnand %p644_p5, %p177_p7  ;;  %s193_s28 = sshll.u32 %s927_s27, 4  ;;  %s194_s28 = int_to_ptr.vmem [resolvable:$true] %s193_s28 }
  0x10   : > { %s1012_s29 = sadd.s32 1, %s925_s21   ;;  %s33_s8 = sadd.s32 1, %s921_s20 }
  0x11   : > { %s1244_s26 = scalar_select %p1004_p8, 1, 0 }
  0x12   : > { %p699_p10 = pneg %p1004_p8  ;;  %s30_s6 = ssub.s32 %s925_s21, %s1012_s29 }
  0x13   : > { %p1022_p12 = scmp.eq.s32.totalorder %s30_s6, 0  ;;  %s765_s11 = scalar_lea.hbm %s1235_s2, 128 }
  0x14   : > { %p1016_p11 = pnand %p699_p10, %p1239_p1  ;;  %p766_p0 = scmp.ne.s32.totalorder %s1235_s2, %s765_s11 }
  0x15   : > { %s1246_s7 = scalar_select %p1022_p12, 1, 0 }
  0x16   : > { %p767_p3 = pneg %p1016_p11  ;;  %p772_p10 = scmp.lt.u32.totalorder %s765_s11, %s1235_s2 }
  0x18   : > { %p768_p5 = pnand %p767_p3, %p766_p0 }
  0x1a   : > { %p769_p7 = pneg %p768_p5 }
  0x1c   : > { %p774_p9 = pnand %p772_p10, %p769_p7 }
  0x1e   : > { %777 = shalt.err (!%p774_p9)
}
  0x1f   : > { %s778_s16 = scalar_lea.vmem %s194_s28, 128  ;;  %p786_p6 = scmp.lt.s32.totalorder %s194_s28, %s194_s28 }
  0x20   : > { %p779_p1 = scmp.ne.s32.totalorder %s194_s28, %s778_s16  ;;  %p787_p4 = scmp.lt.s32.totalorder %s778_s16, %s778_s16 }
  0x22   : > { %p781_p2 = pnand %p779_p1, %p767_p3  ;;  %p788_p8 = por %p787_p4, %p786_p6 }
  0x24   : > { %p782_p13 = pneg %p781_p2 }
  0x26   : > { %p789_p12 = pnand %p788_p8, %p782_p13 }
  0x28   : > { %792 = shalt.err (!%p789_p12)
}
  0x29   : > { %702 = dma.hbm_to_vmem [thread:$0]  (!%p1016_p11), %s1235_s2, 128, %s194_s28, [#allocation6]  }
  0x2a   : > { %p1247_p1 = scmp.ne.s32.totalorder %s1246_s7, 0  ;;  %p41_p2 = scmp.eq.s32.totalorder %s925_s21, 0 }
  0x2b   : > { %p1248_p4 = scmp.ne.s32.totalorder %s921_s20, %s917_s19  ;;  %p1249_p6 = scmp.eq.s32.totalorder %s985_s22, 1 }
  0x2c   : > { %s1048_s27 = scalar_select %p1247_p1, %s921_s20, %s33_s8  }
  0x2d   : > { %p1056_p8 = por %p1249_p6, %p1248_p4  ;;  %p715_p9 = scmp.lt.s32.totalorder %s925_s21, 2 }
  0x2e   : > { %s204_s6 = sand.u32 1, %s921_s20   ;;  %p1251_p12 = pmov %p1248_p4 }
  0x2f   : > { %s647_s9 = sshll.u32 %s204_s6, 3  ;;  %s648_s10 = sshll.u32 %s925_s21, 7 }
  0x30   : > { %p42_p13 = por %p41_p2, %p1251_p12  ;;  %s1069_s28 = scalar_lea.hbm %s1233_s0, %s648_s10 }
  0x31   : > { %s208_s7 = scalar_lea.vmem [#allocation2], %s647_s9  ;;  %s205_s14 = scalar_lea.sflag [#allocation3], %s204_s6 }
  0x32   : > { %s215_s8 = sshll.u32 %s208_s7, 4  ;;  %p1071_p11 = pnand %p715_p9, %p42_p13  ;;  %s1075_s8 = int_to_ptr.vmem [resolvable:$true] %s215_s8 }
  0x33   : > { %s793_s15 = scalar_lea.hbm %s1069_s28, 128  ;;  %s798_s23 = scalar_lea.hbm %s1233_s0, 256 }
  0x34   : > { %p794_p0 = scmp.ne.s32.totalorder %s1069_s28, %s793_s15  ;;  %p795_p3 = pneg %p1071_p11 }
  0x35   : > { %p799_p10 = scmp.lt.u32.totalorder %s1069_s28, %s1233_s0  ;;  %p800_p1 = scmp.lt.u32.totalorder %s798_s23, %s793_s15 }
  0x36   : > { %p796_p5 = pnand %p795_p3, %p794_p0  ;;  %p802_p4 = scmp.lt.u32.totalorder %s793_s15, %s1069_s28 }
  0x37   : > { %p801_p2 = por %p800_p1, %p799_p10 }
  0x38   : > { %p797_p7 = pneg %p796_p5 }
  0x39   : > { %p803_p6 = por %p802_p4, %p801_p2 }
  0x3b   : > { %p804_p9 = pnand %p803_p6, %p797_p7 }
  0x3d   : > { %807 = shalt.err (!%p804_p9)
}
  0x3e   : > { %s808_s6 = scalar_lea.vmem %s1075_s8, 128  ;;  %s928_s11 = smov [#allocation2]  }
  0x3f   : > { %p809_p12 = scmp.ne.s32.totalorder %s1075_s8, %s808_s6  ;;  %s813_s12 = sshll.u32 %s928_s11, 4  ;;  %s814_s12 = int_to_ptr.vmem [resolvable:$false] %s813_s12 }
  0x40   : > { %s815_s7 = scalar_lea.vmem %s814_s12, 256  ;;  %p816_p5 = scmp.lt.s32.totalorder %s1075_s8, %s814_s12 }
  0x41   : > { %p811_p13 = pnand %p809_p12, %p795_p3  ;;  %p817_p10 = scmp.lt.s32.totalorder %s815_s7, %s808_s6 }
  0x43   : > { %p812_p0 = pneg %p811_p13  ;;  %p818_p1 = por %p817_p10, %p816_p5 }
  0x45   : > { %p819_p2 = pnand %p818_p1, %p812_p0 }
  0x47   : > { %822 = shalt.err (!%p819_p2)
}
  0x48   : > { %706 = dma.hbm_to_vmem [thread:$0]  (!%p1071_p11), %s1069_s28, 128, %s1075_s8, %s205_s14  }
  0x49   : > { %p1253_p7 = scmp.ne.s32.totalorder %s1244_s26, 0 }
  0x4a   : > { %s1105_s15 = sand.u32 (!%p1253_p7), 1, %s917_s19   ;;  %p1254_p3 = scmp.ne.s32.totalorder (!%p1253_p7), %s1242_s24, 0 }
  0x4b   : > { %231 = sbr.rel (%p1253_p7) target bundleno = 639 (0x27f), region = 36  ;;  %s650_s16 = sshll.u32 (!%p1253_p7), %s1105_s15, 3 }
  0x4c   : > { %s234_s17 = scalar_lea.sflag (!%p1253_p7), [#allocation3], %s1105_s15  ;;  %s237_s23 = scalar_lea.vmem (!%p1253_p7), [#allocation2], %s650_s16 }
  0x52   : > { %896 = dma.done.wait (%p1254_p3), %s234_s17, 128  }
  0x53   : > { %898 = vsyncadd (%p1254_p3), %s234_s17, 4294967168  ;;  %p1255_p4 = scmp.eq.s32.totalorder %s985_s22, 0 }
  0x55   : > { %900 = dma.done.wait (%p1255_p4), [#allocation6], 128   ;;  %p1256_p11 = pmov %p1255_p4 }
  0x56   : > { %v929_v0 = vmov 0.0   ;;  %vm930_vm0 = vmmov 0   ;;  %v755_v1 = vld [vmem:[%s1234_s1] sm:$0xff]   ;;  %v756_v2 = vld [vmem:[%s1234_s1 + $0x8] sm:$0xff]   ;;  %vm303_vm1 = vcmask 261120   ;;  %v286_v5 = vld [vmem:[#allocation5] sm:$0xff]  ;;  %v287_v7 = vlaneseq }
  0x57   : > { %902 = vsyncadd (%p1256_p11), [#allocation6], 4294967168  ;;  %669 = vmatprep.subr.bf16.mxu0 %v929_v0  ;;  %673 = vmatprep.mubr.msk.bf16.mxu0 %vm930_vm0, %v929_v0  ;;  %v280_v3 = vld [vmem:[%s237_s23] sm:$0xff]  ;;  %v931_v6 = vmov 0   ;;  %v356_v30 = vpack.c.bf16 %v286_v5, %v286_v5  ;;  %p275_p6 = scmp.lt.s32.totalorder %s985_s22, 1  ;;  %s658_s11 = sshll.u32 %s985_s22, 4 }
  0x58   : > { %677 = vmatprep.subr.bf16.mxu1 %v929_v0  ;;  %679 = vmatprep.mubr.msk.bf16.mxu1 %vm930_vm0, %v929_v0  ;;  %v281_v4 = vpack.c.bf16 %v280_v3, %v280_v3  ;;  %v288_v8 = vshrl.u32 %v287_v7, 7  ;;  %s268_s12 = scalar_lea.vmem [#allocation7], %s1105_s15  ;;  %vm488_vm5 = vcmask 59394   ;;  %s1142_s23 = scalar_lea.hbm %s1237_s4, %s658_s11 }
  0x59   : > { %670 = vmatpush3.bf16.msra.mxu0 %v755_v1  ;;  %754 = vset.pattern.permute.xlu0 %v931_v6  ;;  %s276_s13 = scalar_select %p275_p6, %s985_s22, 1 }
  0x5a   : > { %671 = vmatprep.subr.bf16.mxu0 %v929_v0  ;;  %458 = vperm.xlu0 %754, %v286_v5   ;;  %v289_v9 = vsub.s32 0, %v288_v8  ;;  %s514_s7 = sshll.u32 %s268_s12, 4  ;;  %s274_s26 = scalar_lea.vmem [#allocation8], %s1105_s15  ;;  %s1144_s7 = int_to_ptr.vmem [resolvable:$true] %s514_s7 }
  0x5b   : > { %s652_s14 = sshll.u32 %s276_s13, 2  ;;  %s1149_s28 = sshll.u32 %s274_s26, 4  ;;  %s1186_s28 = int_to_ptr.vmem [resolvable:$true] %s1149_s28 }
  0x5c   : > { %v290_v10 = vrot.slane %v286_v5, %v289_v9  ;;  %s278_s6 = scalar_lea.vmem %s1236_s3, %s652_s14  ;;  %s498_s8 = scalar_lea.sflag [#allocation4], %s1105_s15 }
  0x5d   : > { %672 = vmatpush3.bf16.msra.mxu0 %v756_v2  ;;  %v480_v57 = vld [vmem:[%s278_s6] sm:$0x7]  ;;  %s823_s24 = scalar_lea.vmem %s1144_s7, 16  ;;  %s932_s13 = smov [#allocation7]  }
  0x5e   : > { %683 = vmatprep.subr.bf16.mxu0 %v929_v0  ;;  %vm482_vm2 = vcmp.ne.f32.partialorder %v480_v57, 0.0  ;;  %v491_v62 = vrot.slane %v480_v57, 6  ;;  %vm481_vm3 = vcmp.eq.f32.partialorder %v480_v57, 3.0  ;;  %p824_p9 = scmp.ne.s32.totalorder %s1144_s7, %s823_s24  ;;  %s827_s14 = sshll.u32 %s932_s13, 4  ;;  %s828_s14 = int_to_ptr.vmem [resolvable:$false] %s827_s14 }
  0x5f   : > { %v483_v59 = vsel %vm482_vm2, 1, %v931_v6  ;;  %s829_s9 = scalar_lea.vmem %s828_s14, 32  ;;  %p830_p0 = scmp.lt.s32.totalorder %s1144_s7, %s828_s14 }
  0x60   : > { %674 = vmatmul.mubr.msk.bf16.vlgmr.msra.gmra.mrb[0].mxu0 %vm303_vm1, %v281_v4  ;;  %v484_v60 = vrot.slane %v483_v59, 7  ;;  %p825_p12 = pnand %p824_p9, %p1056_p8  ;;  %p831_p5 = scmp.lt.s32.totalorder %s829_s9, %s823_s24 }
  0x61   : > { %685 = vmatprep.mubr.msk.bf16.mxu0 %vm930_vm0, %v929_v0 }
  0x62   : > { %vm485_vm4 = vcmp.ne.s32.totalorder %v484_v60, 0  ;;  %p826_p13 = pneg %p825_p12  ;;  %p832_p10 = por %p831_p5, %p830_p0 }
  0x63   : > { %vm1151_vm6 = vmand %vm481_vm3, %vm485_vm4 }
  0x64   : > { %p833_p1 = pnand %p832_p10, %p826_p13 }
  0xd9   : > { %v459_v32 = vpop.permute.xlu0 %458 }
  0xda   : > { %v460_v41 = vrot.slane %v459_v32, 1  ;;  %v471_v52 = vrot.slane %v459_v32, 2 }
 0x133   : > { %v341_v11 = vpop.f32.mrb[0].mxu0 }
 0x134   : > { %v342_v12 = vadd.f32 %v341_v11, %v290_v10  ;;  %v675_v13 = vpop.f32.mrb[1].mxu0 }
 0x135   : > { %v344_v14 = vpop.f32.mrb[2].mxu0 }
 0x136   : > { %v347_v15 = vmul.f32 %v342_v12, %v342_v12  ;;  %v676_v16 = vpop.f32.mrb[3].mxu0 }
 0x138   : > { %v348_v17 = vmul.f32 %v347_v15, %v342_v12 }
 0x13a   : > { %v349_v18 = vmul.f32 0.044715, %v348_v17 }
 0x13c   : > { %v350_v19 = vadd.f32 %v349_v18, %v342_v12 }
 0x13e   : > { %v351_v20 = vmul.f32 0.7978846, %v350_v19 }
 0x140   : > { %757 = vtanh.f32 %v351_v20 }
 0x14a   : > { %v758_v21 = vpop.eup %757 }
 0x14b   : > { %v353_v22 = vadd.f32 1.0, %v758_v21 }
 0x14d   : > { %v354_v23 = vmul.f32 0.5, %v353_v22 }
 0x14f   : > { %v355_v24 = vmul.f32 %v354_v23, %v342_v12 }
 0x151   : > { %v357_v25 = vpack.c.bf16 %v355_v24, %v355_v24  ;;  %v358_v26 = vmul.f32 %v355_v24, %v355_v24 }
 0x153   : > { %v364_v27 = vsel %vm303_vm1, %v357_v25, 0  ;;  %v359_v28 = vpack.c.bf16 %v358_v26, %v358_v26 }
 0x154   : > { %678 = vmatpush3.bf16.xpose.msra.mxu1 %v364_v27 }
 0x155   : > { %v407_v29 = vsel %vm303_vm1, %v359_v28, 0 }
 0x156   : > { %684 = vmatpush3.bf16.xpose.msra.mxu0 %v407_v29 }
 0x15b   : > { %680 = vmatmul.mubr.msk.bf16.vlgmr.msra.gmra.mrb[0].mxu1 %vm303_vm1, %v356_v30 }
 0x15d   : > { %686 = vmatmul.mubr.msk.bf16.vlgmr.msra.gmra.mrb[4].mxu0 %vm303_vm1, %v356_v30 }
 0x22e   : > { %v400_v31 = vpop.f32.mrb[0].mxu1 }
 0x22f   : > { %v449_v33 = vmul.f32 0.03125, %v400_v31  ;;  %v681_v34 = vpop.f32.mrb[1].mxu1 }
 0x230   : > { %v403_v35 = vpop.f32.mrb[2].mxu1  ;;  %v443_v36 = vpop.f32.mrb[4].mxu0 }
 0x231   : > { %v451_v37 = vmul.f32 %v449_v33, %v449_v33  ;;  %v450_v38 = vmul.f32 0.03125, %v443_v36  ;;  %v682_v39 = vpop.f32.mrb[3].mxu1  ;;  %v687_v40 = vpop.f32.mrb[5].mxu0  ;;  %v462_v46 = vmul.f32 %v460_v41, %v449_v33 }
 0x232   : > { %v446_v42 = vpop.f32.mrb[6].mxu0 }
 0x233   : > { %v452_v43 = vsub.f32 %v450_v38, %v451_v37  ;;  %v688_v44 = vpop.f32.mrb[7].mxu0  ;;  %v464_v48 = vrot.slane %v462_v46, 1 }
 0x235   : > { %v453_v45 = vmax.f32 %v452_v43, 0.0  ;;  %v466_v49 = vsub.f32 %v400_v31, %v464_v48 }
 0x237   : > { %v454_v47 = vadd.f32 1e-12, %v453_v45  ;;  %v468_v50 = vrot.slane %v466_v49, 7 }
 0x239   : > { %759 = vrsqrt.f32 %v454_v47 }
 0x243   : > { %v760_v51 = vpop.eup %759 }
 0x244   : > { %v470_v53 = vmul.f32 %v760_v51, %v468_v50 }
 0x246   : > { %v473_v54 = vadd.f32 %v471_v52, %v470_v53 }
 0x248   : > { %v474_v55 = vmul.f32 1.442695, %v473_v54  ;;  %v476_v56 = vsub.f32 0.0, %v473_v54 }
 0x24a   : > { %v477_v58 = vmul.f32 1.442695, %v476_v56  ;;  %761 = vpow2.f32 %v474_v55 }
 0x24c   : > { %763 = vpow2.f32 %v477_v58 }
 0x254   : > { %v762_v61 = vpop.eup %761 }
 0x256   : > { %v764_v63 = vpop.eup %763 }
 0x257   : > { %v479_v0 = vsub.f32 %v762_v61, %v764_v63 }
 0x259   : > { %v487_v1 = vsel %vm481_vm3, %v479_v0, 0.0  ;;  %v493_v2 = vsub.f32 %v479_v0, %v491_v62 }
 0x25a   : > { %489 = vst.msk [vmem:[%s268_s12 - $0x2] sm:$0x4] %vm488_vm5, %v487_v1 }
 0x25b   : > { %836 = shalt.err (!%p833_p1)
}
 0x25c   : > { %s837_s10 = scalar_lea.hbm %s1142_s23, 16  ;;  %s841_s16 = scalar_lea.hbm %s1237_s4, 32 }
 0x25d   : > { %p838_p2 = scmp.ne.s32.totalorder %s1142_s23, %s837_s10  ;;  %p842_p4 = scmp.lt.u32.totalorder %s1142_s23, %s1237_s4 }
 0x25e   : > { %p843_p11 = scmp.lt.u32.totalorder %s841_s16, %s837_s10  ;;  %p845_p9 = scmp.lt.u32.totalorder %s837_s10, %s1142_s23 }
 0x25f   : > { %p839_p7 = pnand %p838_p2, %p1056_p8 }
 0x260   : > { %p844_p6 = por %p843_p11, %p842_p4 }
 0x261   : > { %p840_p3 = pneg %p839_p7 }
 0x262   : > { %p846_p12 = por %p845_p9, %p844_p6 }
 0x264   : > { %p847_p13 = pnand %p846_p12, %p840_p3 }
 0x266   : > { %850 = shalt.err (!%p847_p13)
}
 0x267   : > { %695 = dma.vmem_to_hbm [thread:$0]  (%p1056_p8), %s1144_s7, 16, %s1142_s23, %s498_s8   ;;  %v494_v4 = vmul.f32 %v493_v2, %v493_v2 }
 0x268   : > { %s1183_s9 = scalar_lea.hbm %s1238_s5, %s658_s11  ;;  %s502_s10 = scalar_lea.sflag [#allocation9], %s1105_s15 }
 0x269   : > { %v495_v5 = vsel %vm1151_vm6, %v494_v4, 0.0  ;;  %s851_s7 = scalar_lea.vmem %s1186_s28, 16  ;;  %s933_s22 = smov [#allocation8]  }
 0x26a   : > { %496 = vst.msk [vmem:[%s274_s26 - $0x2] sm:$0x4] %vm488_vm5, %v495_v5  ;;  %p852_p0 = scmp.ne.s32.totalorder %s1186_s28, %s851_s7  ;;  %s855_s11 = sshll.u32 %s933_s22, 4  ;;  %s856_s11 = int_to_ptr.vmem [resolvable:$false] %s855_s11 }
 0x26b   : > { %s857_s23 = scalar_lea.vmem %s856_s11, 32  ;;  %p858_p1 = scmp.lt.s32.totalorder %s1186_s28, %s856_s11 }
 0x26c   : > { %p853_p5 = pnand %p852_p0, %p1056_p8  ;;  %p859_p2 = scmp.lt.s32.totalorder %s857_s23, %s851_s7 }
 0x26e   : > { %p854_p10 = pneg %p853_p5  ;;  %p860_p7 = por %p859_p2, %p858_p1 }
 0x270   : > { %p861_p3 = pnand %p860_p7, %p854_p10 }
 0x272   : > { %864 = shalt.err (!%p861_p3)
}
 0x273   : > { %s865_s15 = scalar_lea.hbm %s1183_s9, 16  ;;  %s869_s6 = scalar_lea.hbm %s1238_s5, 32 }
 0x274   : > { %p866_p4 = scmp.ne.s32.totalorder %s1183_s9, %s865_s15  ;;  %p870_p9 = scmp.lt.u32.totalorder %s1183_s9, %s1238_s5 }
 0x275   : > { %p871_p12 = scmp.lt.u32.totalorder %s869_s6, %s865_s15  ;;  %p873_p0 = scmp.lt.u32.totalorder %s865_s15, %s1183_s9 }
 0x276   : > { %p867_p11 = pnand %p866_p4, %p1056_p8 }
 0x277   : > { %p872_p13 = por %p871_p12, %p870_p9 }
 0x278   : > { %p868_p6 = pneg %p867_p11 }
 0x279   : > { %p874_p5 = por %p873_p0, %p872_p13 }
 0x27b   : > { %p875_p10 = pnand %p874_p5, %p868_p6 }
 0x27d   : > { %878 = shalt.err (!%p875_p10)
}
 0x27e   : > { %696 = dma.vmem_to_hbm [thread:$0]  (%p1056_p8), %s1186_s28, 16, %s1183_s9, %s502_s10  }
 0x27f PF: > { %s539_s17 = sand.u32 1, %s913_s18   ;;  %p1259_p1 = scmp.ne.s32.totalorder %s1243_s25, 0 }
 0x280   : > { %p1260_p2 = scmp.ge.s32.totalorder %s925_s21, 2  ;;  %s540_s13 = scalar_lea.sflag [#allocation4], %s539_s17 }
 0x282   : > { %p708_p7 = pnand %p1260_p2, %p1259_p1 }
 0x284   : > { %904 = dma.done.wait (!%p708_p7), %s540_s13, 16  }
 0x285   : > { %906 = vsyncadd (!%p708_p7), %s540_s13, 4294967280  ;;  %s548_s24 = scalar_lea.sflag [#allocation9], %s539_s17 }
 0x286   : > { %908 = dma.done.wait (!%p708_p7), %s548_s24, 16  }
 0x287   : > { %910 = vsyncadd (!%p708_p7), %s548_s24, 4294967280  ;;  %p23_p8 = scmp.ge.s32.totalorder %s1012_s29, 4   ;;  %s1261_s18 = smov %s917_s19 }
 0x288   : > { %s1262_s19 = smov %s921_s20  ;;  %s1263_s20 = smov %s1048_s27 }
 0x289   : > { %s1264_s21 = smov %s1012_s29  ;;  %25 = sbr.rel (!%p23_p8) target bundleno = 8 (0x8), region = 105 }
 0x290   :  { %552 = vsyncpa [#allocation3], 1 }
 0x291   :  { %554 = vsyncpa [#allocation3 + $0x1], 1 }
 0x292   :  { %555 = vsyncpa [#allocation6], 1 }
 0x293   :  { %556 = vsyncpa [#allocation4], 1 }
 0x294   :  { %558 = vsyncpa [#allocation4 + $0x1], 1 }
 0x295   :  { %559 = vsyncpa [#allocation9], 1 }
 0x296   :  { %561 = vsyncpa [#allocation9 + $0x1], 1 }

</bundles_post_ra>
